<compile_context>
chip_gen: v7x
topology: tpu7x:2x2x1
jax: 0.10.0
libtpu: 0.0.40
codegen_flags: <defaults>
</compile_context>

<pallas_src>
import jax
import jax.numpy as jnp
from jax.experimental import pallas as pl
from jax.experimental.pallas import tpu as pltpu


# ---------------------------------------------------------------------------
# helpers
# ---------------------------------------------------------------------------
def _round_up(x, m):
    return ((x + m - 1) // m) * m


_VMEM_LIMIT = 32 * 1024 * 1024  # safe on v5e/v6e/v7x scoped VMEM


# ---------------------------------------------------------------------------
# Kernel A: fused n-layer GCN for small graphs (everything resident in VMEM).
#   operands: A_hat, X, (W_l, b_l) * n_layers  -> out
# ---------------------------------------------------------------------------
def _make_fused_kernel(n_layers):
    def kernel(a_ref, x_ref, *rest):
        o_ref = rest[-1]
        wb = rest[:-1]
        a = a_ref[...]                       # bf16 (N_pad, N_pad)
        h = x_ref[...]                       # bf16 (N_pad, D_pad)
        for l in range(n_layers):
            w = wb[2 * l][...]               # bf16 (D_pad, D_pad)
            b = wb[2 * l + 1][...]           # f32  (1, D_pad)
            xw = jnp.dot(h, w, preferred_element_type=jnp.float32)
            agg = jnp.dot(a, xw.astype(a.dtype), preferred_element_type=jnp.float32)
            h = (agg + b).astype(x_ref.dtype)
            # F.dropout(training=False) -> identity
        o_ref[...] = h.astype(o_ref.dtype)
    return kernel


def _gcn_fused(a_pad, x_pad, ws, bs):
    n_pad, d_pad = x_pad.shape
    n_layers = len(ws)
    operands = [a_pad, x_pad]
    for w, b in zip(ws, bs):
        operands += [w, b]

    flops = n_layers * (2 * n_pad * d_pad * d_pad + 2 * n_pad * n_pad * d_pad)
    bytes_accessed = sum(int(op.size) * op.dtype.itemsize for op in operands)
    bytes_accessed += n_pad * d_pad * jnp.dtype(x_pad.dtype).itemsize  # output

    vmem = pl.BlockSpec(memory_space=pltpu.MemorySpace.VMEM)
    return pl.pallas_call(
        _make_fused_kernel(n_layers),
        out_shape=jax.ShapeDtypeStruct((n_pad, d_pad), x_pad.dtype),
        in_specs=[vmem] * len(operands),
        out_specs=vmem,
        cost_estimate=pl.CostEstimate(
            flops=flops, transcendentals=0, bytes_accessed=bytes_accessed),
        compiler_params=pltpu.CompilerParams(vmem_limit_bytes=_VMEM_LIMIT),
    )(*operands)


# ---------------------------------------------------------------------------
# Kernel B1: XW = H @ W, row-tiled (phase 1 of the tiled layer).
# ---------------------------------------------------------------------------
def _xw_kernel(x_ref, w_ref, o_ref):
    o_ref[...] = jnp.dot(
        x_ref[...], w_ref[...], preferred_element_type=jnp.float32
    ).astype(o_ref.dtype)


# ---------------------------------------------------------------------------
# Kernel B2: out = A_hat @ XW + b, grid=(row_tiles, k_tiles), f32 accumulator.
# ---------------------------------------------------------------------------
def _agg_bias_kernel(a_ref, xw_ref, b_ref, o_ref, acc_ref):
    @pl.when(pl.program_id(1) == 0)
    def _():
        acc_ref[...] = jnp.zeros_like(acc_ref)

    acc_ref[...] += jnp.dot(
        a_ref[...], xw_ref[...], preferred_element_type=jnp.float32)

    @pl.when(pl.program_id(1) == pl.num_programs(1) - 1)
    def _():
        o_ref[...] = (acc_ref[...] + b_ref[...]).astype(o_ref.dtype)


def _gcn_layer_tiled(a_pad, h_pad, w_pad, b_pad):
    n_pad, d_pad = h_pad.shape
    itm = jnp.dtype(h_pad.dtype).itemsize

    # MXU-friendly tiles (256 edge on v6e/v7x); fall back to 128 for small N.
    tm = 256 if n_pad % 256 == 0 else 128
    if n_pad % 512 == 0:
        tk = 512
    elif n_pad % 256 == 0:
        tk = 256
    else:
        tk = 128

    # --- phase 1: XW = H @ W ------------------------------------------------
    xw = pl.pallas_call(
        _xw_kernel,
        grid=(n_pad // tm,),
        in_specs=[
            pl.BlockSpec((tm, d_pad), lambda i: (i, 0)),
            pl.BlockSpec((d_pad, d_pad), lambda i: (0, 0)),
        ],
        out_specs=pl.BlockSpec((tm, d_pad), lambda i: (i, 0)),
        out_shape=jax.ShapeDtypeStruct((n_pad, d_pad), h_pad.dtype),
        cost_estimate=pl.CostEstimate(
            flops=2 * n_pad * d_pad * d_pad, transcendentals=0,
            bytes_accessed=(2 * n_pad * d_pad + d_pad * d_pad) * itm),
        compiler_params=pltpu.CompilerParams(
            dimension_semantics=("parallel",),
            vmem_limit_bytes=_VMEM_LIMIT),
    )(h_pad, w_pad)

    # --- phase 2: out = A_hat @ XW + b  (k-reduction last, row axis parallel)
    out = pl.pallas_call(
        _agg_bias_kernel,
        grid=(n_pad // tm, n_pad // tk),
        in_specs=[
            pl.BlockSpec((tm, tk), lambda i, k: (i, k)),
            pl.BlockSpec((tk, d_pad), lambda i, k: (k, 0)),
            pl.BlockSpec((1, d_pad), lambda i, k: (0, 0)),
        ],
        out_specs=pl.BlockSpec((tm, d_pad), lambda i, k: (i, 0)),
        out_shape=jax.ShapeDtypeStruct((n_pad, d_pad), h_pad.dtype),
        scratch_shapes=[pltpu.VMEM((tm, d_pad), jnp.float32)],
        cost_estimate=pl.CostEstimate(
            flops=2 * n_pad * n_pad * d_pad, transcendentals=0,
            bytes_accessed=(n_pad * n_pad + 2 * n_pad * d_pad) * itm
            + d_pad * 4),
        compiler_params=pltpu.CompilerParams(
            dimension_semantics=("parallel", "arbitrary"),
            vmem_limit_bytes=_VMEM_LIMIT),
    )(a_pad, xw, b_pad)
    return out


# ---------------------------------------------------------------------------
# Glue: dense normalized adjacency from edge_index (torch_geometric gcn_norm)
# ---------------------------------------------------------------------------
def build_normalized_adjacency(edge_index, num_nodes):
    loop = jnp.arange(num_nodes, dtype=edge_index.dtype)
    src = jnp.concatenate([edge_index[0], loop])   # source / j
    dst = jnp.concatenate([edge_index[1], loop])   # target / i

    ones = jnp.ones(src.shape[0], dtype=jnp.float32)
    deg = jnp.zeros((num_nodes,), jnp.float32).at[dst].add(ones)
    deg_inv_sqrt = jnp.where(deg > 0, jax.lax.rsqrt(jnp.maximum(deg, 1e-12)), 0.0)
    norm = deg_inv_sqrt[src] * deg_inv_sqrt[dst]

    a_hat = jnp.zeros((num_nodes, num_nodes), jnp.float32).at[dst, src].add(norm)
    return a_hat


# ---------------------------------------------------------------------------
# GCN model: 3 stacked GCNConv layers (dropout = identity in eval mode)
# ---------------------------------------------------------------------------
def init_gcn_params(key, d_model, n_layers=3):
    params = []
    for _ in range(n_layers):
        key, wk = jax.random.split(key)
        limit = (6.0 / (d_model + d_model)) ** 0.5   # glorot-uniform
        w = jax.random.uniform(wk, (d_model, d_model), jnp.float32, -limit, limit)
        b = jnp.zeros((d_model,), jnp.float32)       # GCNConv bias zero-init
        params.append((w, b))
    return params


def gcn_forward(params, x, edge_index, *, compute_dtype=jnp.bfloat16,
                force_tiled=False):
    n, d = x.shape
    n_pad = _round_up(n, 128)
    d_pad = _round_up(d, 128)

    a_hat = build_normalized_adjacency(edge_index, n)

    # lane-dense, zero-padded operands in bf16 (f32 accumulation in-kernel)
    a_pad = jnp.zeros((n_pad, n_pad), compute_dtype).at[:n, :n].set(
        a_hat.astype(compute_dtype))
    x_pad = jnp.zeros((n_pad, d_pad), compute_dtype).at[:n, :d].set(
        x.astype(compute_dtype))
    ws, bs = [], []
    for w, b in params:
        ws.append(jnp.zeros((d_pad, d_pad), compute_dtype).at[:d, :d].set(
            w.astype(compute_dtype)))
        bs.append(jnp.zeros((1, d_pad), jnp.float32).at[0, :d].set(
            b.astype(jnp.float32)))

    # Small-graph regime: whole problem fits comfortably in VMEM -> fuse the
    # 3 layers into one pallas_call (A_hat loaded once, 1 launch instead of 6).
    itm = jnp.dtype(compute_dtype).itemsize
    resident_bytes = itm * (n_pad * n_pad + 2 * n_pad * d_pad
                            + len(params) * d_pad * d_pad) + 4 * len(params) * d_pad
    if (not force_tiled) and resident_bytes <= (8 << 20):
        out_pad = _gcn_fused(a_pad, x_pad, ws, bs)
    else:
        h = x_pad
        for w_p, b_p in zip(ws, bs):
            h = _gcn_layer_tiled(a_pad, h, w_p, b_p)
            # F.dropout(training=False) -> identity
        out_pad = h

    return out_pad[:n, :d].astype(jnp.float32)


# ---------------------------------------------------------------------------
# Pure-JAX f32 reference (for in-script correctness check)
# ---------------------------------------------------------------------------
def gcn_reference(params, x, edge_index):
    a_hat = build_normalized_adjacency(edge_index, x.shape[0])
    h = x
    for w, b in params:
        h = a_hat @ (h @ w) + b
    return h


# ---------------------------------------------------------------------------
if __name__ == "__main__":
    key = jax.random.PRNGKey(0)

    # --- small demo (fused single-kernel path) -----------------------------
    num_nodes, d_model, num_edges = 16, 32, 48
    k_x, k_e, k_p, k_x2, k_e2, k_p2 = jax.random.split(key, 6)

    x = jax.random.normal(k_x, (num_nodes, d_model), jnp.float32)
    edge_index = jax.random.randint(k_e, (2, num_edges), 0, num_nodes, jnp.int32)
    params = init_gcn_params(k_p, d_model, n_layers=3)

    out = gcn_forward(params, x, edge_index)
    out = jax.block_until_ready(out)
    assert out.shape == (num_nodes, d_model)
    assert jnp.all(jnp.isfinite(out))

    ref = gcn_reference(params, x, edge_index)
    assert jnp.allclose(out, ref, rtol=5e-2, atol=5e-2), (
        float(jnp.max(jnp.abs(out - ref))))

    # --- larger graph exercising the tiled grid path ------------------------
    n2, e2 = 300, 1200
    x2 = jax.random.normal(k_x2, (n2, d_model), jnp.float32)
    edge_index2 = jax.random.randint(k_e2, (2, e2), 0, n2, jnp.int32)
    params2 = init_gcn_params(k_p2, d_model, n_layers=3)

    out2 = gcn_forward(params2, x2, edge_index2, force_tiled=True)
    out2 = jax.block_until_ready(out2)
    assert out2.shape == (n2, d_model)
    assert jnp.all(jnp.isfinite(out2))

    ref2 = gcn_reference(params2, x2, edge_index2)
    assert jnp.allclose(out2, ref2, rtol=5e-2, atol=5e-2), (
        float(jnp.max(jnp.abs(out2 - ref2))))

    print("KERNEL_OK")
</pallas_src>

<mosaic_0001>
module attributes {stable_mosaic.version = 11 : i64} {
  func.func @kernel(%arg0: memref<128x128xbf16, #tpu.memory_space<vmem>>, %arg1: memref<128x128xbf16, #tpu.memory_space<vmem>>, %arg2: memref<128x128xbf16, #tpu.memory_space<vmem>>, %arg3: memref<1x128xf32, #tpu.memory_space<vmem>>, %arg4: memref<128x128xbf16, #tpu.memory_space<vmem>>, %arg5: memref<1x128xf32, #tpu.memory_space<vmem>>, %arg6: memref<128x128xbf16, #tpu.memory_space<vmem>>, %arg7: memref<1x128xf32, #tpu.memory_space<vmem>>, %arg8: memref<128x128xbf16, #tpu.memory_space<vmem>>) attributes {dimension_semantics = [], scalar_prefetch = 0 : i64, scratch_operands = 0 : i64, tpu.core_type = #tpu.core_type<tc>} {
    %c0 = arith.constant 0 : index
    %c0_0 = arith.constant 0 : index
    %0 = vector.load %arg0[%c0, %c0_0] : memref<128x128xbf16, #tpu.memory_space<vmem>>, vector<128x128xbf16>
    %c0_1 = arith.constant 0 : index
    %c0_2 = arith.constant 0 : index
    %1 = vector.load %arg1[%c0_1, %c0_2] : memref<128x128xbf16, #tpu.memory_space<vmem>>, vector<128x128xbf16>
    %c0_3 = arith.constant 0 : index
    %c0_4 = arith.constant 0 : index
    %2 = vector.load %arg2[%c0_3, %c0_4] : memref<128x128xbf16, #tpu.memory_space<vmem>>, vector<128x128xbf16>
    %c0_5 = arith.constant 0 : index
    %c0_6 = arith.constant 0 : index
    %3 = vector.load %arg3[%c0_5, %c0_6] : memref<1x128xf32, #tpu.memory_space<vmem>>, vector<1x128xf32>
    %cst = arith.constant dense<0.000000e+00> : vector<128x128xf32>
    %4 = tpu.matmul %1, %2, %cst {dimension_numbers = #tpu.dot_dimension_numbers<[1], [0], [0], [1], [0, 0, 1, 1], [], []>} : vector<128x128xbf16>, vector<128x128xbf16>, vector<128x128xf32> -> vector<128x128xf32>
    %5 = arith.truncf %4 : vector<128x128xf32> to vector<128x128xbf16>
    %cst_7 = arith.constant dense<0.000000e+00> : vector<128x128xf32>
    %6 = tpu.matmul %0, %5, %cst_7 {dimension_numbers = #tpu.dot_dimension_numbers<[1], [0], [0], [1], [0, 0, 1, 1], [], []>} : vector<128x128xbf16>, vector<128x128xbf16>, vector<128x128xf32> -> vector<128x128xf32>
    %7 = vector.broadcast %3 : vector<1x128xf32> to vector<128x128xf32>
    %8 = arith.addf %6, %7 : vector<128x128xf32>
    %9 = arith.truncf %8 : vector<128x128xf32> to vector<128x128xbf16>
    %c0_8 = arith.constant 0 : index
    %c0_9 = arith.constant 0 : index
    %10 = vector.load %arg4[%c0_8, %c0_9] : memref<128x128xbf16, #tpu.memory_space<vmem>>, vector<128x128xbf16>
    %c0_10 = arith.constant 0 : index
    %c0_11 = arith.constant 0 : index
    %11 = vector.load %arg5[%c0_10, %c0_11] : memref<1x128xf32, #tpu.memory_space<vmem>>, vector<1x128xf32>
    %cst_12 = arith.constant dense<0.000000e+00> : vector<128x128xf32>
    %12 = tpu.matmul %9, %10, %cst_12 {dimension_numbers = #tpu.dot_dimension_numbers<[1], [0], [0], [1], [0, 0, 1, 1], [], []>} : vector<128x128xbf16>, vector<128x128xbf16>, vector<128x128xf32> -> vector<128x128xf32>
    %13 = arith.truncf %12 : vector<128x128xf32> to vector<128x128xbf16>
    %cst_13 = arith.constant dense<0.000000e+00> : vector<128x128xf32>
    %14 = tpu.matmul %0, %13, %cst_13 {dimension_numbers = #tpu.dot_dimension_numbers<[1], [0], [0], [1], [0, 0, 1, 1], [], []>} : vector<128x128xbf16>, vector<128x128xbf16>, vector<128x128xf32> -> vector<128x128xf32>
    %15 = vector.broadcast %11 : vector<1x128xf32> to vector<128x128xf32>
    %16 = arith.addf %14, %15 : vector<128x128xf32>
    %17 = arith.truncf %16 : vector<128x128xf32> to vector<128x128xbf16>
    %c0_14 = arith.constant 0 : index
    %c0_15 = arith.constant 0 : index
    %18 = vector.load %arg6[%c0_14, %c0_15] : memref<128x128xbf16, #tpu.memory_space<vmem>>, vector<128x128xbf16>
    %c0_16 = arith.constant 0 : index
    %c0_17 = arith.constant 0 : index
    %19 = vector.load %arg7[%c0_16, %c0_17] : memref<1x128xf32, #tpu.memory_space<vmem>>, vector<1x128xf32>
    %cst_18 = arith.constant dense<0.000000e+00> : vector<128x128xf32>
    %20 = tpu.matmul %17, %18, %cst_18 {dimension_numbers = #tpu.dot_dimension_numbers<[1], [0], [0], [1], [0, 0, 1, 1], [], []>} : vector<128x128xbf16>, vector<128x128xbf16>, vector<128x128xf32> -> vector<128x128xf32>
    %21 = arith.truncf %20 : vector<128x128xf32> to vector<128x128xbf16>
    %cst_19 = arith.constant dense<0.000000e+00> : vector<128x128xf32>
    %22 = tpu.matmul %0, %21, %cst_19 {dimension_numbers = #tpu.dot_dimension_numbers<[1], [0], [0], [1], [0, 0, 1, 1], [], []>} : vector<128x128xbf16>, vector<128x128xbf16>, vector<128x128xf32> -> vector<128x128xf32>
    %23 = vector.broadcast %19 : vector<1x128xf32> to vector<128x128xf32>
    %24 = arith.addf %22, %23 : vector<128x128xf32>
    %25 = arith.truncf %24 : vector<128x128xf32> to vector<128x128xbf16>
    %c0_20 = arith.constant 0 : index
    %c0_21 = arith.constant 0 : index
    %26 = vector.load %arg8[%c0_20, %c0_21] : memref<128x128xbf16, #tpu.memory_space<vmem>>, vector<128x128xbf16>
    tpu.vector_store %arg8[%c0_20, %c0_21], %25 {strides = array<i32>} : memref<128x128xbf16, #tpu.memory_space<vmem>>, vector<128x128xbf16>,
    return
  }
}

</mosaic_0001>

<bundles_post_ra>
// kernel: tpu_custom_call.1
= control target key start
LH: loop header
LB: loop body
LE: loop exit
PB: predicated region body
PF: predicated region fallthrough
CT: control target
= control target key end

     0   :  { %13 = vsyncpa [#allocation3], 0  ;;  %s1965_s0 = inlined_call_operand.hbm [shape: bf16[128,128], index: 0, kind: input, shape index: {}]   ;;  %s1966_s1 = inlined_call_operand.hbm [shape: bf16[128,128], index: 1, kind: input, shape index: {}]   ;;  %s1967_s2 = inlined_call_operand.hbm [shape: bf16[128,128], index: 2, kind: input, shape index: {}]   ;;  %s1968_s3 = inlined_call_operand.vmem [shape: f32[1,128], index: 3, kind: input, shape index: {}]   ;;  %s1969_s4 = inlined_call_operand.hbm [shape: bf16[128,128], index: 4, kind: input, shape index: {}]   ;;  %s1970_s5 = inlined_call_operand.vmem [shape: f32[1,128], index: 5, kind: input, shape index: {}]   ;;  %s1971_s6 = inlined_call_operand.hbm [shape: bf16[128,128], index: 6, kind: input, shape index: {}]   ;;  %s1972_s7 = inlined_call_operand.vmem [shape: f32[1,128], index: 7, kind: input, shape index: {}]   ;;  %s1973_s8 = inlined_call_operand.hbm [shape: bf16[128,128], index: 8, kind: output, shape index: {}]  }
   0x1   :  { %14 = vsyncpa [#allocation6], 0 }
   0x2   :  { %15 = vsyncpa [#allocation9], 0 }
   0x3   :  { %16 = vsyncpa [#allocation4], 0  ;;  %s1759_s27 = smov [#allocation5]   ;;  %s1760_s29 = smov [#allocation8]  }
   0x4   :  { %s34_s28 = sshll.u32 %s1759_s27, 4  ;;  %s60_s30 = sshll.u32 %s1760_s29, 4  ;;  %s35_s28 = int_to_ptr.vmem [resolvable:$true] %s34_s28  ;;  %s1812_s30 = int_to_ptr.vmem [resolvable:$true] %s60_s30 }
   0x5   :  { %s1619_s11 = scalar_lea.hbm %s1966_s1, 1024 }
   0x6   :  { %p1620_p0 = scmp.ne.s32.totalorder %s1966_s1, %s1619_s11  ;;  %p1623_p1 = scmp.lt.u32.totalorder %s1619_s11, %s1966_s1 }
   0x8   :  { %p1625_p2 = pnand %p1623_p1, %p1620_p0 }
   0xa   :  { %1628 = shalt.err (!%p1625_p2)
}
   0xb   :  { %s1629_s16 = scalar_lea.vmem %s35_s28, 1024  ;;  %p1634_p4 = scmp.lt.s32.totalorder %s35_s28, %s35_s28 }
   0xc   :  { %p1630_p3 = scmp.ne.s32.totalorder %s35_s28, %s1629_s16  ;;  %p1635_p5 = scmp.lt.s32.totalorder %s1629_s16, %s1629_s16 }
   0xe   :  { %p1636_p6 = por %p1635_p5, %p1634_p4 }
  0x10   :  { %p1637_p7 = pnand %p1636_p6, %p1630_p3 }
  0x12   :  { %1640 = shalt.err (!%p1637_p7)
}
  0x13   :  { %s1761_s17 = smov 64   ;;  %s1762_s18 = smov 4  }
  0x14   :  { %40 = dma.hbm_to_vmem [thread:$0]  %s1966_s1, 1024, %s35_s28, [#allocation6], %s1761_s17, %s1761_s17, %s1762_s18  }
  0x15   :  { %s1641_s23 = scalar_lea.hbm %s1969_s4, 1024 }
  0x16   :  { %p1642_p8 = scmp.ne.s32.totalorder %s1969_s4, %s1641_s23  ;;  %p1645_p9 = scmp.lt.u32.totalorder %s1641_s23, %s1969_s4 }
  0x18   :  { %p1647_p10 = pnand %p1645_p9, %p1642_p8 }
  0x1a   :  { %1650 = shalt.err (!%p1647_p10)
}
  0x1b   :  { %s1651_s29 = scalar_lea.vmem %s1812_s30, 1024  ;;  %p1656_p12 = scmp.lt.s32.totalorder %s1812_s30, %s1812_s30 }
  0x1c   :  { %p1652_p11 = scmp.ne.s32.totalorder %s1812_s30, %s1651_s29  ;;  %p1657_p13 = scmp.lt.s32.totalorder %s1651_s29, %s1651_s29 }
  0x1e   :  { %p1658_p0 = por %p1657_p13, %p1656_p12 }
  0x20   :  { %p1659_p1 = pnand %p1658_p0, %p1652_p11 }
  0x22   :  { %1662 = shalt.err (!%p1659_p1)
}
  0x23   :  { %66 = dma.hbm_to_vmem [thread:$0]  %s1969_s4, 1024, %s1812_s30, [#allocation9], %s1761_s17, %s1761_s17, %s1762_s18  }
  0x24   :  { %s1763_s9 = smov [#allocation2]   ;;  %s1764_s11 = smov [#allocation7]  }
  0x25   :  { %s22_s10 = sshll.u32 %s1763_s9, 4  ;;  %s46_s12 = sshll.u32 %s1764_s11, 4  ;;  %s23_s10 = int_to_ptr.vmem [resolvable:$true] %s22_s10  ;;  %s1849_s12 = int_to_ptr.vmem [resolvable:$true] %s46_s12 }
  0x26   :  { %s1663_s15 = scalar_lea.hbm %s1965_s0, 1024 }
  0x27   :  { %p1664_p2 = scmp.ne.s32.totalorder %s1965_s0, %s1663_s15  ;;  %p1667_p3 = scmp.lt.u32.totalorder %s1663_s15, %s1965_s0 }
  0x29   :  { %p1669_p4 = pnand %p1667_p3, %p1664_p2 }
  0x2b   :  { %1672 = shalt.err (!%p1669_p4)
}
  0x2c   :  { %s1673_s4 = scalar_lea.vmem %s23_s10, 1024  ;;  %p1678_p6 = scmp.lt.s32.totalorder %s23_s10, %s23_s10 }
  0x2d   :  { %p1674_p5 = scmp.ne.s32.totalorder %s23_s10, %s1673_s4  ;;  %p1679_p7 = scmp.lt.s32.totalorder %s1673_s4, %s1673_s4 }
  0x2f   :  { %p1680_p8 = por %p1679_p7, %p1678_p6 }
  0x31   :  { %p1681_p9 = pnand %p1680_p8, %p1674_p5 }
  0x33   :  { %1684 = shalt.err (!%p1681_p9)
}
  0x34   :  { %28 = dma.hbm_to_vmem [thread:$0]  %s1965_s0, 1024, %s23_s10, [#allocation3], %s1761_s17, %s1761_s17, %s1762_s18  }
  0x35   :  { %s1685_s25 = scalar_lea.hbm %s1967_s2, 1024 }
  0x36   :  { %p1686_p10 = scmp.ne.s32.totalorder %s1967_s2, %s1685_s25  ;;  %p1689_p11 = scmp.lt.u32.totalorder %s1685_s25, %s1967_s2 }
  0x38   :  { %p1691_p12 = pnand %p1689_p11, %p1686_p10 }
  0x3a   :  { %1694 = shalt.err (!%p1691_p12)
}
  0x3b   :  { %s1695_s28 = scalar_lea.vmem %s1849_s12, 1024  ;;  %p1700_p0 = scmp.lt.s32.totalorder %s1849_s12, %s1849_s12 }
  0x3c   :  { %p1696_p13 = scmp.ne.s32.totalorder %s1849_s12, %s1695_s28  ;;  %p1701_p1 = scmp.lt.s32.totalorder %s1695_s28, %s1695_s28 }
  0x3e   :  { %p1702_p2 = por %p1701_p1, %p1700_p0 }
  0x40   :  { %p1703_p3 = pnand %p1702_p2, %p1696_p13 }
  0x42   :  { %1706 = shalt.err (!%p1703_p3)
}
  0x43   :  { %52 = dma.hbm_to_vmem [thread:$0]  %s1967_s2, 1024, %s1849_s12, [#allocation6], %s1761_s17, %s1761_s17, %s1762_s18  }
  0x44   :  { %s1765_s10 = smov [#allocation10]   ;;  %s1707_s15 = scalar_lea.hbm %s1971_s6, 1024 }
  0x45   :  { %s74_s11 = sshll.u32 %s1765_s10, 4  ;;  %p1708_p4 = scmp.ne.s32.totalorder %s1971_s6, %s1707_s15  ;;  %s75_s11 = int_to_ptr.vmem [resolvable:$true] %s74_s11 }
  0x46   :  { %p1711_p5 = scmp.lt.u32.totalorder %s1707_s15, %s1971_s6 }
  0x48   :  { %p1713_p6 = pnand %p1711_p5, %p1708_p4 }
  0x4a   :  { %1716 = shalt.err (!%p1713_p6)
}
  0x4b   :  { %s1717_s4 = scalar_lea.vmem %s75_s11, 1024  ;;  %p1722_p8 = scmp.lt.s32.totalorder %s75_s11, %s75_s11 }
  0x4c   :  { %p1718_p7 = scmp.ne.s32.totalorder %s75_s11, %s1717_s4  ;;  %p1723_p9 = scmp.lt.s32.totalorder %s1717_s4, %s1717_s4 }
  0x4e   :  { %p1724_p10 = por %p1723_p9, %p1722_p8 }
  0x50   :  { %p1725_p11 = pnand %p1724_p10, %p1718_p7 }
  0x52   :  { %1728 = shalt.err (!%p1725_p11)
}
  0x53   :  { %80 = dma.hbm_to_vmem [thread:$0]  %s1971_s6, 1024, %s75_s11, [#allocation9], %s1761_s17, %s1761_s17, %s1762_s18  }
  0x54   :  { %1751 = dma.done.wait [#allocation3], 1024  }
  0x55   :  { %1752 = vsyncadd [#allocation3], 4294966272 }
  0x56   :  { %1753 = dma.done.wait [#allocation6], 2048  }
  0x57   :  { %1754 = vsyncadd [#allocation6], 4294965248 }
  0x58   :  { %1755 = dma.done.wait [#allocation9], 2048  }
  0x59   :  { %1756 = vsyncadd [#allocation9], 4294965248  ;;  %v1579_v0 = vld [vmem:[#allocation7] sm:$0xff]   ;;  %v1580_v1 = vld [vmem:[#allocation7 + $0x8] sm:$0xff]  }
  0x5a   :  { %1379 = vmatprep.subr.bf16.mxu0 %v1579_v0  ;;  %v1581_v2 = vld [vmem:[#allocation7 + $0x10] sm:$0xff]   ;;  %v1582_v3 = vld [vmem:[#allocation7 + $0x18] sm:$0xff]   ;;  %v1587_v4 = vld [vmem:[#allocation5] sm:$0xff]  }
  0x5b   :  { %1380 = vmatpush3.bf16.msra.mxu0 %v1579_v0  ;;  %1395 = vmatprep.mubr.bf16.mxu0 %v1587_v4  ;;  %v1583_v5 = vld [vmem:[#allocation7 + $0x20] sm:$0xff]   ;;  %v1584_v6 = vld [vmem:[#allocation7 + $0x28] sm:$0xff]   ;;  %v1585_v7 = vld [vmem:[#allocation7 + $0x30] sm:$0xff]  }
  0x5c   :  { %1381 = vmatprep.subr.bf16.mxu0 %v1580_v1  ;;  %v1586_v8 = vld [vmem:[#allocation7 + $0x38] sm:$0xff]   ;;  %v1588_v9 = vld [vmem:[#allocation5 + $0x8] sm:$0xff]   ;;  %v1589_v10 = vld [vmem:[#allocation5 + $0x10] sm:$0xff]  }
  0x5d   :  { %v1590_v11 = vld [vmem:[#allocation5 + $0x18] sm:$0xff]   ;;  %v1591_v12 = vld [vmem:[#allocation5 + $0x20] sm:$0xff]   ;;  %v1592_v13 = vld [vmem:[#allocation5 + $0x28] sm:$0xff]  }
  0x5e   :  { %v1593_v14 = vld [vmem:[#allocation5 + $0x30] sm:$0xff]   ;;  %v1594_v15 = vld [vmem:[#allocation5 + $0x38] sm:$0xff]   ;;  %v1901_v16 = vld [vmem:[#allocation2] sm:$0xff]  }
  0x5f   :  { %1382 = vmatpush3.bf16.msra.mxu0 %v1580_v1  ;;  %1427 = vmatprep.mubr.bf16.mxu1 %v1901_v16  ;;  %v1603_v17 = vld [vmem:[#allocation8] sm:$0xff]   ;;  %v1604_v18 = vld [vmem:[#allocation8 + $0x8] sm:$0xff]   ;;  %v1605_v19 = vld [vmem:[#allocation8 + $0x10] sm:$0xff]  }
  0x60   :  { %1383 = vmatprep.subr.bf16.mxu0 %v1581_v2  ;;  %v1606_v20 = vld [vmem:[#allocation8 + $0x18] sm:$0xff]   ;;  %v1607_v21 = vld [vmem:[#allocation8 + $0x20] sm:$0xff]   ;;  %v1608_v22 = vld [vmem:[#allocation8 + $0x28] sm:$0xff]  }
  0x61   :  { %v1904_v47 = vld [vmem:[#allocation2 + $0x8] sm:$0xff]   ;;  %v1906_v48 = vld [vmem:[#allocation2 + $0x10] sm:$0xff]   ;;  %v1910_v49 = vld [vmem:[#allocation2 + $0x18] sm:$0xff]  }
  0x62   :  { %v1912_v50 = vld [vmem:[#allocation2 + $0x20] sm:$0xff]   ;;  %v1916_v51 = vld [vmem:[#allocation2 + $0x28] sm:$0xff]   ;;  %v1918_v52 = vld [vmem:[#allocation2 + $0x30] sm:$0xff]  }
  0x63   :  { %1384 = vmatpush3.bf16.msra.mxu0 %v1581_v2  ;;  %v1922_v53 = vld [vmem:[#allocation2 + $0x38] sm:$0xff]   ;;  %v1609_v54 = vld [vmem:[#allocation8 + $0x30] sm:$0xff]   ;;  %v1177_v57 = vld [vmem:[%s1968_s3] ss:$0 sm:$0xff] }
  0x64   :  { %1385 = vmatprep.subr.bf16.mxu0 %v1582_v3  ;;  %v1610_v55 = vld [vmem:[#allocation8 + $0x38] sm:$0xff]  }
  0x67   :  { %1386 = vmatpush3.bf16.msra.mxu0 %v1582_v3 }
  0x68   :  { %1387 = vmatprep.subr.bf16.mxu0 %v1583_v5 }
  0x6b   :  { %1388 = vmatpush3.bf16.msra.mxu0 %v1583_v5 }
  0x6c   :  { %1389 = vmatprep.subr.bf16.mxu0 %v1584_v6 }
  0x6f   :  { %1390 = vmatpush3.bf16.msra.mxu0 %v1584_v6 }
  0x70   :  { %1391 = vmatprep.subr.bf16.mxu0 %v1585_v7 }
  0x73   :  { %1392 = vmatpush3.bf16.msra.mxu0 %v1585_v7 }
  0x74   :  { %1393 = vmatprep.subr.bf16.mxu0 %v1586_v8 }
  0x77   :  { %1394 = vmatpush3.bf16.msra.mxu0 %v1586_v8 }
  0x78   :  { %1443 = vmatprep.subr.bf16.mxu0 %v1603_v17 }
  0x7a   :  { %1396 = vmatmul.mubr.bf16.vlgmr.msra.gmra.mrb[0].mxu0 %v1588_v9 }
  0x7b   :  { %1399 = vmatprep.mubr.bf16.mxu0 %v1589_v10  ;;  %1444 = vmatpush3.bf16.msra.mxu0 %v1603_v17 }
  0x7c   :  { %1445 = vmatprep.subr.bf16.mxu0 %v1604_v18 }
  0x7f   :  { %1446 = vmatpush3.bf16.msra.mxu0 %v1604_v18 }
  0x80   :  { %1447 = vmatprep.subr.bf16.mxu0 %v1605_v19 }
  0x82   :  { %1400 = vmatmul.mubr.bf16.gmra.mrb[4].mxu0 %v1590_v11 }
  0x83   :  { %1403 = vmatprep.mubr.bf16.mxu0 %v1591_v12  ;;  %1448 = vmatpush3.bf16.msra.mxu0 %v1605_v19 }
  0x84   :  { %1449 = vmatprep.subr.bf16.mxu0 %v1606_v20 }
  0x87   :  { %1450 = vmatpush3.bf16.msra.mxu0 %v1606_v20 }
  0x88   :  { %1451 = vmatprep.subr.bf16.mxu0 %v1607_v21 }
  0x8a   :  { %1404 = vmatmul.mubr.bf16.gmra.mrb[8].mxu0 %v1592_v13 }
  0x8b   :  { %1407 = vmatprep.mubr.bf16.mxu0 %v1593_v14  ;;  %1452 = vmatpush3.bf16.msra.mxu0 %v1607_v21 }
  0x8c   :  { %1453 = vmatprep.subr.bf16.mxu0 %v1608_v22 }
  0x8f   :  { %1454 = vmatpush3.bf16.msra.mxu0 %v1608_v22 }
  0x90   :  { %1455 = vmatprep.subr.bf16.mxu0 %v1609_v54 }
  0x92   :  { %1408 = vmatmul.mubr.bf16.gmra.mrb[12].mxu0 %v1594_v15 }
  0x93   :  { %1456 = vmatpush3.bf16.msra.mxu0 %v1609_v54 }
  0x94   :  { %1457 = vmatprep.subr.bf16.mxu0 %v1610_v55 }
  0x97   :  { %1458 = vmatpush3.bf16.msra.mxu0 %v1610_v55 }
 0x14d   :  { %v1397_v23 = vpop.f32.mrb[0].mxu0 }
 0x14e   :  { %v278_v24 = vpop.f32.mrb[1].mxu0 }
 0x14f   :  { %v1398_v25 = vpop.f32.mrb[2].mxu0 }
 0x150   :  { %v342_v26 = vpack.c.bf16 %v1398_v25, %v1397_v23  ;;  %v281_v27 = vpop.f32.mrb[3].mxu0 }
 0x151   :  { %v341_v28 = vpack.c.bf16 %v281_v27, %v278_v24 }
 0x153   :  { %1411 = vmatprep.subr.bf16.mxu1 %v341_v28 }
 0x154   :  { %1412 = vmatpush3.bf16.msra.mxu1 %v341_v28 }
 0x155   :  { %v1401_v29 = vpop.f32.mrb[4].mxu0  ;;  %1413 = vmatprep.subr.bf16.mxu1 %v342_v26 }
 0x156   :  { %v294_v30 = vpop.f32.mrb[5].mxu0 }
 0x157   :  { %v1402_v31 = vpop.f32.mrb[6].mxu0 }
 0x158   :  { %v344_v32 = vpack.c.bf16 %v1402_v31, %v1401_v29  ;;  %v297_v33 = vpop.f32.mrb[7].mxu0  ;;  %1414 = vmatpush3.bf16.msra.mxu1 %v342_v26 }
 0x159   :  { %v343_v34 = vpack.c.bf16 %v297_v33, %v294_v30 }
 0x15b   :  { %1415 = vmatprep.subr.bf16.mxu1 %v343_v34 }
 0x15c   :  { %1416 = vmatpush3.bf16.msra.mxu1 %v343_v34  ;;  %v1611_v34 = vld [vmem:[#allocation10] sm:$0xff]  }
 0x15d   :  { %v1405_v35 = vpop.f32.mrb[8].mxu0  ;;  %1417 = vmatprep.subr.bf16.mxu1 %v344_v32  ;;  %1507 = vmatprep.subr.bf16.mxu0 %v1611_v34 }
 0x15e   :  { %v310_v36 = vpop.f32.mrb[9].mxu0 }
 0x15f   :  { %v1406_v37 = vpop.f32.mrb[10].mxu0 }
 0x160   :  { %v346_v38 = vpack.c.bf16 %v1406_v37, %v1405_v35  ;;  %v313_v39 = vpop.f32.mrb[11].mxu0  ;;  %1418 = vmatpush3.bf16.msra.mxu1 %v344_v32  ;;  %v1612_v35 = vld [vmem:[#allocation10 + $0x8] sm:$0xff]   ;;  %v1614_v37 = vld [vmem:[#allocation10 + $0x18] sm:$0xff]  }
 0x161   :  { %v345_v40 = vpack.c.bf16 %v313_v39, %v310_v36  ;;  %v1613_v36 = vld [vmem:[#allocation10 + $0x10] sm:$0xff]   ;;  %v1616_v39 = vld [vmem:[#allocation10 + $0x28] sm:$0xff]  }
 0x163   :  { %1419 = vmatprep.subr.bf16.mxu1 %v345_v40 }
 0x164   :  { %1420 = vmatpush3.bf16.msra.mxu1 %v345_v40 }
 0x165   :  { %v1409_v41 = vpop.f32.mrb[12].mxu0  ;;  %1421 = vmatprep.subr.bf16.mxu1 %v346_v38 }
 0x166   :  { %v326_v42 = vpop.f32.mrb[13].mxu0 }
 0x167   :  { %v1410_v43 = vpop.f32.mrb[14].mxu0 }
 0x168   :  { %v348_v44 = vpack.c.bf16 %v1410_v43, %v1409_v41  ;;  %v329_v45 = vpop.f32.mrb[15].mxu0  ;;  %1422 = vmatpush3.bf16.msra.mxu1 %v346_v38  ;;  %v1615_v38 = vld [vmem:[#allocation10 + $0x20] sm:$0xff]  }
 0x169   :  { %v347_v46 = vpack.c.bf16 %v329_v45, %v326_v42 }
 0x16b   :  { %1423 = vmatprep.subr.bf16.mxu1 %v347_v46 }
 0x16c   :  { %1424 = vmatpush3.bf16.msra.mxu1 %v347_v46 }
 0x16d   :  { %1425 = vmatprep.subr.bf16.mxu1 %v348_v44 }
 0x170   :  { %1426 = vmatpush3.bf16.msra.mxu1 %v348_v44 }
 0x173   :  { %1428 = vmatmul.mubr.bf16.vlgmr.msra.gmra.mrb[0].mxu1 %v1904_v47 }
 0x174   :  { %1431 = vmatprep.mubr.bf16.mxu1 %v1906_v48 }
 0x17b   :  { %1432 = vmatmul.mubr.bf16.gmra.mrb[4].mxu1 %v1910_v49 }
 0x17c   :  { %1435 = vmatprep.mubr.bf16.mxu1 %v1912_v50 }
 0x183   :  { %1436 = vmatmul.mubr.bf16.gmra.mrb[8].mxu1 %v1916_v51 }
 0x184   :  { %1439 = vmatprep.mubr.bf16.mxu1 %v1918_v52 }
 0x18b   :  { %1440 = vmatmul.mubr.bf16.gmra.mrb[12].mxu1 %v1922_v53 }
 0x18c   :  { %1491 = vmatprep.mubr.bf16.mxu1 %v1901_v16 }
 0x246   :  { %v1429_v56 = vpop.f32.mrb[0].mxu1 }
 0x247   :  { %v437_v58 = vpop.f32.mrb[1].mxu1  ;;  %v446_v60 = vadd.f32 %v1429_v56, %v1177_v57 }
 0x248   :  { %v1430_v59 = vpop.f32.mrb[2].mxu1  ;;  %v438_v63 = vadd.f32 %v1177_v57, %v437_v58 }
 0x249   :  { %v449_v61 = vadd.f32 %v1430_v59, %v1177_v57  ;;  %v440_v62 = vpop.f32.mrb[3].mxu1 }
 0x24a   :  { %v441_v0 = vadd.f32 %v1177_v57, %v440_v62 }
 0x24b   :  { %v501_v1 = vpack.c.bf16 %v449_v61, %v446_v60 }
 0x24c   :  { %v500_v2 = vpack.c.bf16 %v441_v0, %v438_v63 }
 0x24e   :  { %v1433_v3 = vpop.f32.mrb[4].mxu1  ;;  %1459 = vmatprep.mubr.bf16.mxu0 %v500_v2 }
 0x24f   :  { %v453_v4 = vpop.f32.mrb[5].mxu1  ;;  %1460 = vmatmul.mubr.bf16.vlgmr.msra.gmra.mrb[16].mxu0 %v501_v1  ;;  %v462_v6 = vadd.f32 %v1433_v3, %v1177_v57 }
 0x250   :  { %v1434_v5 = vpop.f32.mrb[6].mxu1  ;;  %v454_v9 = vadd.f32 %v1177_v57, %v453_v4  ;;  %1508 = vmatpush3.bf16.msra.mxu0 %v1611_v34 }
 0x251   :  { %v465_v7 = vadd.f32 %v1434_v5, %v1177_v57  ;;  %v456_v8 = vpop.f32.mrb[7].mxu1  ;;  %1509 = vmatprep.subr.bf16.mxu0 %v1612_v35 }
 0x252   :  { %v457_v10 = vadd.f32 %v1177_v57, %v456_v8  ;;  %v1618_v8 = vld [vmem:[#allocation10 + $0x38] sm:$0xff]  }
 0x253   :  { %v503_v11 = vpack.c.bf16 %v465_v7, %v462_v6  ;;  %v1617_v7 = vld [vmem:[#allocation10 + $0x30] sm:$0xff]  }
 0x254   :  { %v502_v12 = vpack.c.bf16 %v457_v10, %v454_v9  ;;  %1510 = vmatpush3.bf16.msra.mxu0 %v1612_v35  ;;  %v1194_v10 = vld [vmem:[%s1970_s5] ss:$0 sm:$0xff] }
 0x255   :  { %1511 = vmatprep.subr.bf16.mxu0 %v1613_v36 }
 0x256   :  { %v1437_v13 = vpop.f32.mrb[8].mxu1  ;;  %1463 = vmatprep.mubr.bf16.mxu0 %v502_v12 }
 0x257   :  { %v469_v14 = vpop.f32.mrb[9].mxu1  ;;  %1464 = vmatmul.mubr.bf16.gmra.mrb[20].mxu0 %v503_v11  ;;  %v478_v17 = vadd.f32 %v1437_v13, %v1177_v57 }
 0x258   :  { %v1438_v15 = vpop.f32.mrb[10].mxu1  ;;  %v470_v20 = vadd.f32 %v1177_v57, %v469_v14  ;;  %1512 = vmatpush3.bf16.msra.mxu0 %v1613_v36 }
 0x259   :  { %v481_v18 = vadd.f32 %v1438_v15, %v1177_v57  ;;  %v472_v19 = vpop.f32.mrb[11].mxu1  ;;  %1513 = vmatprep.subr.bf16.mxu0 %v1614_v37 }
 0x25a   :  { %v473_v21 = vadd.f32 %v1177_v57, %v472_v19 }
 0x25b   :  { %v505_v22 = vpack.c.bf16 %v481_v18, %v478_v17 }
 0x25c   :  { %v504_v23 = vpack.c.bf16 %v473_v21, %v470_v20  ;;  %1514 = vmatpush3.bf16.msra.mxu0 %v1614_v37 }
 0x25d   :  { %1515 = vmatprep.subr.bf16.mxu0 %v1615_v38 }
 0x25e   :  { %v1441_v24 = vpop.f32.mrb[12].mxu1  ;;  %1467 = vmatprep.mubr.bf16.mxu0 %v504_v23 }
 0x25f   :  { %v485_v25 = vpop.f32.mrb[13].mxu1  ;;  %1468 = vmatmul.mubr.bf16.gmra.mrb[24].mxu0 %v505_v22  ;;  %v494_v27 = vadd.f32 %v1441_v24, %v1177_v57 }
 0x260   :  { %v1442_v26 = vpop.f32.mrb[14].mxu1  ;;  %v486_v30 = vadd.f32 %v1177_v57, %v485_v25  ;;  %1516 = vmatpush3.bf16.msra.mxu0 %v1615_v38 }
 0x261   :  { %v497_v28 = vadd.f32 %v1442_v26, %v1177_v57  ;;  %v488_v29 = vpop.f32.mrb[15].mxu1  ;;  %1517 = vmatprep.subr.bf16.mxu0 %v1616_v39 }
 0x262   :  { %v489_v31 = vadd.f32 %v1177_v57, %v488_v29 }
 0x263   :  { %v507_v32 = vpack.c.bf16 %v497_v28, %v494_v27 }
 0x264   :  { %v506_v33 = vpack.c.bf16 %v489_v31, %v486_v30  ;;  %1518 = vmatpush3.bf16.msra.mxu0 %v1616_v39 }
 0x265   :  { %1519 = vmatprep.subr.bf16.mxu0 %v1617_v7 }
 0x266   :  { %1471 = vmatprep.mubr.bf16.mxu0 %v506_v33 }
 0x267   :  { %1472 = vmatmul.mubr.bf16.gmra.mrb[28].mxu0 %v507_v32 }
 0x268   :  { %1520 = vmatpush3.bf16.msra.mxu0 %v1617_v7 }
 0x269   :  { %1521 = vmatprep.subr.bf16.mxu0 %v1618_v8 }
 0x26c   :  { %1522 = vmatpush3.bf16.msra.mxu0 %v1618_v8 }
 0x322   :  { %v1461_v40 = vpop.f32.mrb[16].mxu0 }
 0x323   :  { %v607_v41 = vpop.f32.mrb[17].mxu0 }
 0x324   :  { %v1462_v42 = vpop.f32.mrb[18].mxu0 }
 0x325   :  { %v671_v43 = vpack.c.bf16 %v1462_v42, %v1461_v40  ;;  %v610_v44 = vpop.f32.mrb[19].mxu0 }
 0x326   :  { %v670_v45 = vpack.c.bf16 %v610_v44, %v607_v41 }
 0x328   :  { %1475 = vmatprep.subr.bf16.mxu1 %v670_v45 }
 0x329   :  { %1476 = vmatpush3.bf16.msra.mxu1 %v670_v45 }
 0x32a   :  { %v1465_v46 = vpop.f32.mrb[20].mxu0  ;;  %1477 = vmatprep.subr.bf16.mxu1 %v671_v43 }
 0x32b   :  { %v623_v54 = vpop.f32.mrb[21].mxu0 }
 0x32c   :  { %v1466_v55 = vpop.f32.mrb[22].mxu0 }
 0x32d   :  { %v673_v56 = vpack.c.bf16 %v1466_v55, %v1465_v46  ;;  %v626_v57 = vpop.f32.mrb[23].mxu0  ;;  %1478 = vmatpush3.bf16.msra.mxu1 %v671_v43 }
 0x32e   :  { %v672_v58 = vpack.c.bf16 %v626_v57, %v623_v54 }
 0x330   :  { %1479 = vmatprep.subr.bf16.mxu1 %v672_v58 }
 0x331   :  { %1480 = vmatpush3.bf16.msra.mxu1 %v672_v58 }
 0x332   :  { %v1469_v59 = vpop.f32.mrb[24].mxu0  ;;  %1481 = vmatprep.subr.bf16.mxu1 %v673_v56 }
 0x333   :  { %v639_v60 = vpop.f32.mrb[25].mxu0 }
 0x334   :  { %v1470_v61 = vpop.f32.mrb[26].mxu0 }
 0x335   :  { %v675_v62 = vpack.c.bf16 %v1470_v61, %v1469_v59  ;;  %v642_v63 = vpop.f32.mrb[27].mxu0  ;;  %1482 = vmatpush3.bf16.msra.mxu1 %v673_v56 }
 0x336   :  { %v674_v0 = vpack.c.bf16 %v642_v63, %v639_v60 }
 0x338   :  { %1483 = vmatprep.subr.bf16.mxu1 %v674_v0 }
 0x339   :  { %1484 = vmatpush3.bf16.msra.mxu1 %v674_v0 }
 0x33a   :  { %v1473_v1 = vpop.f32.mrb[28].mxu0  ;;  %1485 = vmatprep.subr.bf16.mxu1 %v675_v62 }
 0x33b   :  { %v655_v2 = vpop.f32.mrb[29].mxu0 }
 0x33c   :  { %v1474_v3 = vpop.f32.mrb[30].mxu0 }
 0x33d   :  { %v677_v4 = vpack.c.bf16 %v1474_v3, %v1473_v1  ;;  %v658_v5 = vpop.f32.mrb[31].mxu0  ;;  %1486 = vmatpush3.bf16.msra.mxu1 %v675_v62 }
 0x33e   :  { %v676_v6 = vpack.c.bf16 %v658_v5, %v655_v2 }
 0x340   :  { %1487 = vmatprep.subr.bf16.mxu1 %v676_v6 }
 0x341   :  { %1488 = vmatpush3.bf16.msra.mxu1 %v676_v6 }
 0x342   :  { %1489 = vmatprep.subr.bf16.mxu1 %v677_v4 }
 0x345   :  { %1490 = vmatpush3.bf16.msra.mxu1 %v677_v4 }
 0x348   :  { %1492 = vmatmul.mubr.bf16.vlgmr.msra.gmra.mrb[16].mxu1 %v1904_v47 }
 0x349   :  { %1495 = vmatprep.mubr.bf16.mxu1 %v1906_v48 }
 0x350   :  { %1496 = vmatmul.mubr.bf16.gmra.mrb[20].mxu1 %v1910_v49 }
 0x351   :  { %1499 = vmatprep.mubr.bf16.mxu1 %v1912_v50 }
 0x358   :  { %1500 = vmatmul.mubr.bf16.gmra.mrb[24].mxu1 %v1916_v51 }
 0x359   :  { %1503 = vmatprep.mubr.bf16.mxu1 %v1918_v52 }
 0x360   :  { %1504 = vmatmul.mubr.bf16.gmra.mrb[28].mxu1 %v1922_v53 }
 0x361   :  { %1555 = vmatprep.mubr.bf16.mxu1 %v1901_v16 }
 0x41b   :  { %v1493_v9 = vpop.f32.mrb[16].mxu1 }
 0x41c   :  { %v718_v11 = vpop.f32.mrb[17].mxu1  ;;  %v727_v13 = vadd.f32 %v1493_v9, %v1194_v10 }
 0x41d   :  { %v1494_v12 = vpop.f32.mrb[18].mxu1  ;;  %v719_v17 = vadd.f32 %v1194_v10, %v718_v11 }
 0x41e   :  { %v730_v14 = vadd.f32 %v1494_v12, %v1194_v10  ;;  %v721_v15 = vpop.f32.mrb[19].mxu1 }
 0x41f   :  { %v722_v18 = vadd.f32 %v1194_v10, %v721_v15 }
 0x420   :  { %v782_v19 = vpack.c.bf16 %v730_v14, %v727_v13 }
 0x421   :  { %v781_v16 = vpack.c.bf16 %v722_v18, %v719_v17 }
 0x423   :  { %v1497_v20 = vpop.f32.mrb[20].mxu1  ;;  %1523 = vmatprep.mubr.bf16.mxu0 %v781_v16 }
 0x424   :  { %v734_v21 = vpop.f32.mrb[21].mxu1  ;;  %1524 = vmatmul.mubr.bf16.vlgmr.msra.gmra.mrb[32].mxu0 %v782_v19  ;;  %v743_v23 = vadd.f32 %v1497_v20, %v1194_v10  ;;  %v1203_v19 = vld [vmem:[%s1972_s7] ss:$0 sm:$0xff]  ;;  %s1766_s7 = smov [#allocation11]  }
 0x425   :  { %v1498_v22 = vpop.f32.mrb[22].mxu1  ;;  %v735_v26 = vadd.f32 %v1194_v10, %v734_v21  ;;  %s1147_s24 = sshll.u32 %s1766_s7, 4  ;;  %s1148_s24 = int_to_ptr.vmem [resolvable:$true] %s1147_s24 }
 0x426   :  { %v746_v24 = vadd.f32 %v1498_v22, %v1194_v10  ;;  %v737_v25 = vpop.f32.mrb[23].mxu1  ;;  %s1729_s25 = scalar_lea.vmem %s1148_s24, 1024  ;;  %p1734_p13 = scmp.lt.s32.totalorder %s1148_s24, %s1148_s24 }
 0x427   :  { %v738_v27 = vadd.f32 %v1194_v10, %v737_v25  ;;  %p1730_p12 = scmp.ne.s32.totalorder %s1148_s24, %s1729_s25  ;;  %p1735_p0 = scmp.lt.s32.totalorder %s1729_s25, %s1729_s25 }
 0x428   :  { %v784_v28 = vpack.c.bf16 %v746_v24, %v743_v23 }
 0x429   :  { %v783_v29 = vpack.c.bf16 %v738_v27, %v735_v26  ;;  %p1736_p1 = por %p1735_p0, %p1734_p13 }
 0x42b   :  { %v1501_v30 = vpop.f32.mrb[24].mxu1  ;;  %1527 = vmatprep.mubr.bf16.mxu0 %v783_v29  ;;  %p1737_p2 = pnand %p1736_p1, %p1730_p12 }
 0x42c   :  { %v750_v31 = vpop.f32.mrb[25].mxu1  ;;  %1528 = vmatmul.mubr.bf16.gmra.mrb[36].mxu0 %v784_v28  ;;  %v759_v33 = vadd.f32 %v1501_v30, %v1194_v10 }
 0x42d   :  { %v1502_v32 = vpop.f32.mrb[26].mxu1  ;;  %v751_v36 = vadd.f32 %v1194_v10, %v750_v31 }
 0x42e   :  { %v762_v34 = vadd.f32 %v1502_v32, %v1194_v10  ;;  %v753_v35 = vpop.f32.mrb[27].mxu1 }
 0x42f   :  { %v754_v37 = vadd.f32 %v1194_v10, %v753_v35 }
 0x430   :  { %v786_v38 = vpack.c.bf16 %v762_v34, %v759_v33 }
 0x431   :  { %v785_v39 = vpack.c.bf16 %v754_v37, %v751_v36 }
 0x433   :  { %v1505_v40 = vpop.f32.mrb[28].mxu1  ;;  %1531 = vmatprep.mubr.bf16.mxu0 %v785_v39 }
 0x434   :  { %v766_v41 = vpop.f32.mrb[29].mxu1  ;;  %1532 = vmatmul.mubr.bf16.gmra.mrb[40].mxu0 %v786_v38  ;;  %v775_v43 = vadd.f32 %v1505_v40, %v1194_v10 }
 0x435   :  { %v1506_v42 = vpop.f32.mrb[30].mxu1  ;;  %v767_v46 = vadd.f32 %v1194_v10, %v766_v41 }
 0x436   :  { %v778_v44 = vadd.f32 %v1506_v42, %v1194_v10  ;;  %v769_v45 = vpop.f32.mrb[31].mxu1 }
 0x437   :  { %v770_v54 = vadd.f32 %v1194_v10, %v769_v45 }
 0x438   :  { %v788_v55 = vpack.c.bf16 %v778_v44, %v775_v43 }
 0x439   :  { %v787_v56 = vpack.c.bf16 %v770_v54, %v767_v46 }
 0x43b   :  { %1535 = vmatprep.mubr.bf16.mxu0 %v787_v56 }
 0x43c   :  { %1536 = vmatmul.mubr.bf16.gmra.mrb[44].mxu0 %v788_v55 }
 0x4f7   :  { %v1525_v57 = vpop.f32.mrb[32].mxu0 }
 0x4f8   :  { %v888_v58 = vpop.f32.mrb[33].mxu0 }
 0x4f9   :  { %v1526_v59 = vpop.f32.mrb[34].mxu0 }
 0x4fa   :  { %v952_v60 = vpack.c.bf16 %v1526_v59, %v1525_v57  ;;  %v891_v61 = vpop.f32.mrb[35].mxu0 }
 0x4fb   :  { %v951_v62 = vpack.c.bf16 %v891_v61, %v888_v58 }
 0x4fd   :  { %1539 = vmatprep.subr.bf16.mxu1 %v951_v62 }
 0x4fe   :  { %1540 = vmatpush3.bf16.msra.mxu1 %v951_v62 }
 0x4ff   :  { %v1529_v63 = vpop.f32.mrb[36].mxu0  ;;  %1541 = vmatprep.subr.bf16.mxu1 %v952_v60 }
 0x500   :  { %v904_v0 = vpop.f32.mrb[37].mxu0 }
 0x501   :  { %v1530_v1 = vpop.f32.mrb[38].mxu0 }
 0x502   :  { %v954_v2 = vpack.c.bf16 %v1530_v1, %v1529_v63  ;;  %v907_v3 = vpop.f32.mrb[39].mxu0  ;;  %1542 = vmatpush3.bf16.msra.mxu1 %v952_v60 }
 0x503   :  { %v953_v4 = vpack.c.bf16 %v907_v3, %v904_v0 }
 0x505   :  { %1543 = vmatprep.subr.bf16.mxu1 %v953_v4 }
 0x506   :  { %1544 = vmatpush3.bf16.msra.mxu1 %v953_v4 }
 0x507   :  { %v1533_v5 = vpop.f32.mrb[40].mxu0  ;;  %1545 = vmatprep.subr.bf16.mxu1 %v954_v2 }
 0x508   :  { %v920_v6 = vpop.f32.mrb[41].mxu0 }
 0x509   :  { %v1534_v7 = vpop.f32.mrb[42].mxu0 }
 0x50a   :  { %v956_v8 = vpack.c.bf16 %v1534_v7, %v1533_v5  ;;  %v923_v9 = vpop.f32.mrb[43].mxu0  ;;  %1546 = vmatpush3.bf16.msra.mxu1 %v954_v2 }
 0x50b   :  { %v955_v10 = vpack.c.bf16 %v923_v9, %v920_v6 }
 0x50d   :  { %1547 = vmatprep.subr.bf16.mxu1 %v955_v10 }
 0x50e   :  { %1548 = vmatpush3.bf16.msra.mxu1 %v955_v10 }
 0x50f   :  { %v1537_v11 = vpop.f32.mrb[44].mxu0  ;;  %1549 = vmatprep.subr.bf16.mxu1 %v956_v8 }
 0x510   :  { %v936_v12 = vpop.f32.mrb[45].mxu0 }
 0x511   :  { %v1538_v13 = vpop.f32.mrb[46].mxu0 }
 0x512   :  { %v958_v14 = vpack.c.bf16 %v1538_v13, %v1537_v11  ;;  %v939_v15 = vpop.f32.mrb[47].mxu0  ;;  %1550 = vmatpush3.bf16.msra.mxu1 %v956_v8 }
 0x513   :  { %v957_v17 = vpack.c.bf16 %v939_v15, %v936_v12 }
 0x515   :  { %1551 = vmatprep.subr.bf16.mxu1 %v957_v17 }
 0x516   :  { %1552 = vmatpush3.bf16.msra.mxu1 %v957_v17 }
 0x517   :  { %1553 = vmatprep.subr.bf16.mxu1 %v958_v14 }
 0x51a   :  { %1554 = vmatpush3.bf16.msra.mxu1 %v958_v14 }
 0x51d   :  { %1556 = vmatmul.mubr.bf16.vlgmr.msra.gmra.mrb[32].mxu1 %v1904_v47 }
 0x51e   :  { %1559 = vmatprep.mubr.bf16.mxu1 %v1906_v48 }
 0x525   :  { %1560 = vmatmul.mubr.bf16.gmra.mrb[36].mxu1 %v1910_v49 }
 0x526   :  { %1563 = vmatprep.mubr.bf16.mxu1 %v1912_v50 }
 0x52d   :  { %1564 = vmatmul.mubr.bf16.gmra.mrb[40].mxu1 %v1916_v51 }
 0x52e   :  { %1567 = vmatprep.mubr.bf16.mxu1 %v1918_v52 }
 0x535   :  { %1568 = vmatmul.mubr.bf16.gmra.mrb[44].mxu1 %v1922_v53 }
 0x5f0   :  { %v1557_v18 = vpop.f32.mrb[32].mxu1 }
 0x5f1   :  { %v999_v16 = vpop.f32.mrb[33].mxu1  ;;  %v1008_v47 = vadd.f32 %v1557_v18, %v1203_v19 }
 0x5f2   :  { %v1558_v20 = vpop.f32.mrb[34].mxu1  ;;  %v1000_v22 = vadd.f32 %v1203_v19, %v999_v16 }
 0x5f3   :  { %v1011_v21 = vadd.f32 %v1558_v20, %v1203_v19  ;;  %v1002_v48 = vpop.f32.mrb[35].mxu1 }
 0x5f4   :  { %v1003_v49 = vadd.f32 %v1203_v19, %v1002_v48 }
 0x5f5   :  { %v1244_v23 = vpack.c.bf16 %v1011_v21, %v1008_v47 }
 0x5f6   :  { %v1239_v50 = vpack.c.bf16 %v1003_v49, %v1000_v22 }
 0x5f7   :  { %1276 = vst [vmem:[#allocation11 + $0x8] sm:$0xff] %v1244_v23  }
 0x5f8   :  { %1240 = vst [vmem:[#allocation11] sm:$0xff] %v1239_v50   ;;  %v1561_v51 = vpop.f32.mrb[36].mxu1 }
 0x5f9   :  { %v1015_v52 = vpop.f32.mrb[37].mxu1  ;;  %v1024_v53 = vadd.f32 %v1561_v51, %v1203_v19 }
 0x5fa   :  { %v1562_v24 = vpop.f32.mrb[38].mxu1  ;;  %v1016_v27 = vadd.f32 %v1203_v19, %v1015_v52 }
 0x5fb   :  { %v1027_v25 = vadd.f32 %v1562_v24, %v1203_v19  ;;  %v1018_v26 = vpop.f32.mrb[39].mxu1 }
 0x5fc   :  { %v1019_v28 = vadd.f32 %v1203_v19, %v1018_v26 }
 0x5fd   :  { %v1254_v29 = vpack.c.bf16 %v1027_v25, %v1024_v53 }
 0x5fe   :  { %v1249_v30 = vpack.c.bf16 %v1019_v28, %v1016_v27 }
 0x5ff   :  { %1278 = vst [vmem:[#allocation11 + $0x18] sm:$0xff] %v1254_v29  }
 0x600   :  { %1277 = vst [vmem:[#allocation11 + $0x10] sm:$0xff] %v1249_v30   ;;  %v1565_v31 = vpop.f32.mrb[40].mxu1 }
 0x601   :  { %v1031_v32 = vpop.f32.mrb[41].mxu1  ;;  %v1040_v34 = vadd.f32 %v1565_v31, %v1203_v19 }
 0x602   :  { %v1566_v33 = vpop.f32.mrb[42].mxu1  ;;  %v1032_v37 = vadd.f32 %v1203_v19, %v1031_v32 }
 0x603   :  { %v1043_v35 = vadd.f32 %v1566_v33, %v1203_v19  ;;  %v1034_v36 = vpop.f32.mrb[43].mxu1 }
 0x604   :  { %v1035_v38 = vadd.f32 %v1203_v19, %v1034_v36 }
 0x605   :  { %v1264_v39 = vpack.c.bf16 %v1043_v35, %v1040_v34 }
 0x606   :  { %v1259_v40 = vpack.c.bf16 %v1035_v38, %v1032_v37 }
 0x607   :  { %1280 = vst [vmem:[#allocation11 + $0x28] sm:$0xff] %v1264_v39  }
 0x608   :  { %1279 = vst [vmem:[#allocation11 + $0x20] sm:$0xff] %v1259_v40   ;;  %v1569_v41 = vpop.f32.mrb[44].mxu1 }
 0x609   :  { %v1047_v42 = vpop.f32.mrb[45].mxu1  ;;  %v1056_v44 = vadd.f32 %v1569_v41, %v1203_v19 }
 0x60a   :  { %v1570_v43 = vpop.f32.mrb[46].mxu1  ;;  %v1048_v54 = vadd.f32 %v1203_v19, %v1047_v42 }
 0x60b   :  { %v1059_v45 = vadd.f32 %v1570_v43, %v1203_v19  ;;  %v1050_v46 = vpop.f32.mrb[47].mxu1 }
 0x60c   :  { %v1051_v55 = vadd.f32 %v1203_v19, %v1050_v46 }
 0x60d   :  { %v1274_v56 = vpack.c.bf16 %v1059_v45, %v1056_v44 }
 0x60e   :  { %v1269_v57 = vpack.c.bf16 %v1051_v55, %v1048_v54 }
 0x60f   :  { %1282 = vst [vmem:[#allocation11 + $0x38] sm:$0xff] %v1274_v56  }
 0x610   :  { %1281 = vst [vmem:[#allocation11 + $0x30] sm:$0xff] %v1269_v57  }
 0x611   :  { %1740 = shalt.err (!%p1737_p2)
}
 0x612   :  { %s1741_s29 = scalar_lea.hbm %s1973_s8, 1024 }
 0x613   :  { %p1742_p3 = scmp.ne.s32.totalorder %s1973_s8, %s1741_s29  ;;  %p1745_p4 = scmp.lt.u32.totalorder %s1741_s29, %s1973_s8 }
 0x615   :  { %p1747_p5 = pnand %p1745_p4, %p1742_p3 }
 0x617   :  { %1750 = shalt.err (!%p1747_p5)
}
 0x618   :  { %1153 = dma.vmem_to_hbm [thread:$0]  %s1148_s24, 1024, %s1973_s8, [#allocation4], %s1761_s17, %s1761_s17, %s1762_s18  }
 0x619   :  { %1757 = dma.done.wait [#allocation4], 1024  }
 0x61a   :  { %1758 = vsyncadd [#allocation4], 4294966272 }
 0x61b   :  { %1157 = vsyncpa [#allocation3], 1 }
 0x61c   :  { %1158 = vsyncpa [#allocation6], 1 }
 0x61d   :  { %1159 = vsyncpa [#allocation9], 1 }
 0x61e   :  { %1160 = vsyncpa [#allocation4], 1 }

</bundles_post_ra>
